<compile_context>
chip_gen: v5e
topology: v5e:2x2
jax: 0.10.0
libtpu: 0.0.40
codegen_flags: <defaults>
</compile_context>

<pallas_src>
import functools

import jax
import jax.numpy as jnp
from jax import lax
from jax.experimental import pallas as pl
from jax.experimental.pallas import tpu as pltpu


def _tcr_gram_kernel(x_ref, out_ref, *, m, tile, tiles_per_split, need_mask):
    # x_ref  : (tile, p) slab of X for the current (split, m-tile) grid point
    # out_ref: (p, p) f32 partial Gram for this split (resident across t)
    c = pl.program_id(0)   # split index (parallel)
    t = pl.program_id(1)   # m-tile index within split (reduction)

    @pl.when(t == 0)
    def _init():
        out_ref[...] = jnp.zeros_like(out_ref)

    x = x_ref[...].astype(jnp.float32)                    # (tile, p)

    if need_mask:
        # Global (unclamped) tile index; rows >= limit are out-of-bounds
        # garbage (ragged last tile) or belong to a phantom tile (limit <= 0).
        g = c * tiles_per_split + t
        limit = m - g * tile
        row = lax.broadcasted_iota(jnp.int32, x.shape, 0)
        x = jnp.where(row < limit, x, 0.0)

    # X_tile^T @ X_tile : contract dim 0 of both operands -> (p, p) on the MXU.
    out_ref[...] += lax.dot_general(
        x, x,
        dimension_numbers=(((0,), (0,)), ((), ())),
        preferred_element_type=jnp.float32,
    )


def total_coding_rate(X, eps=0.01, *, tile_m=None, num_splits=2,
                      slab_budget_bytes=4 << 20):
    """JAX/Pallas equivalent of TotalCodingRate.forward(X). X: (m, p)."""
    X = jnp.asarray(X)
    if not jnp.issubdtype(X.dtype, jnp.floating):
        X = X.astype(jnp.float32)
    m, p = X.shape
    scale = float(p) / (float(m) * float(eps))            # static constant
    bytes_per_el = jnp.dtype(X.dtype).itemsize

    # --- tile sizing from a VMEM slab budget (multiple of 128 sublane rows) ---
    m_ceil = ((m + 127) // 128) * 128
    if tile_m is None:
        tile = (slab_budget_bytes // (bytes_per_el * p)) // 128 * 128
    else:
        tile = ((int(tile_m) + 127) // 128) * 128
    tile = int(max(128, min(tile, m_ceil)))

    n_tiles = -(-m // tile)                               # cdiv(m, tile)
    n_splits = int(max(1, min(int(num_splits), n_tiles)))
    tiles_per_split = -(-n_tiles // n_splits)             # cdiv
    phantom = (n_splits * tiles_per_split) != n_tiles
    need_mask = (m % tile != 0) or phantom
    last_tile = n_tiles - 1

    if phantom:
        # Clamp phantom tiles onto the last real tile (their contribution is
        # fully masked out in-kernel), so every DMA stays in bounds.
        def x_index_map(c, t):
            return (jnp.minimum(c * tiles_per_split + t, last_tile), 0)
    else:
        def x_index_map(c, t):
            return (c * tiles_per_split + t, 0)

    kernel = functools.partial(
        _tcr_gram_kernel, m=m, tile=tile,
        tiles_per_split=tiles_per_split, need_mask=need_mask)

    # 2 double-buffered input slabs + 2 output buffers + headroom.
    vmem_bytes = 2 * tile * p * bytes_per_el + 2 * p * p * 4 + (4 << 20)
    vmem_limit = int(min(max(vmem_bytes, 16 << 20), 64 << 20))

    partials = pl.pallas_call(
        kernel,
        out_shape=jax.ShapeDtypeStruct((n_splits, p, p), jnp.float32),
        grid_spec=pltpu.PrefetchScalarGridSpec(
            num_scalar_prefetch=0,
            grid=(n_splits, tiles_per_split),
            in_specs=[pl.BlockSpec((tile, p), x_index_map)],
            out_specs=pl.BlockSpec((None, p, p), lambda c, t: (c, 0, 0)),
        ),
        compiler_params=pltpu.CompilerParams(
            dimension_semantics=("parallel", "arbitrary"),
            vmem_limit_bytes=vmem_limit),
    )(X)

    gram = partials[0] if n_splits == 1 else jnp.sum(partials, axis=0)
    M = jnp.eye(p, dtype=jnp.float32) + jnp.float32(scale) * gram

    # TODO(synk): logdet has no Pallas primitive; M is SPD by construction, so
    # use a Cholesky-based logdet: logdet = 2 * sum(log(diag(L))).
    L = jnp.linalg.cholesky(M)
    return -jnp.sum(jnp.log(jnp.diag(L)))                 # == -logdet(M)/2


def _reference_tcr(X, eps=0.01):
    """Pure-JAX transcription of the PyTorch module, for verification."""
    X = jnp.asarray(X, jnp.float32)
    m, p = X.shape
    W = X.T
    I = jnp.eye(p, dtype=jnp.float32)
    scale = p / (m * eps)
    _, logdet = jnp.linalg.slogdet(I + scale * (W @ W.T))
    return -(logdet / 2.0)


if __name__ == "__main__":
    key = jax.random.PRNGKey(0)
    k1, k2 = jax.random.split(key)

    # Multi-tile + ragged case: exercises the split axis, the clamped phantom
    # tile and the in-kernel row mask (m=600, tile=128 -> 5 tiles, 2 splits).
    m, p = 600, 32
    X = jax.random.normal(k1, (m, p), dtype=jnp.float32)
    loss = jax.block_until_ready(total_coding_rate(X, eps=0.01, tile_m=128))
    ref = jax.block_until_ready(_reference_tcr(X, eps=0.01))
    assert jnp.allclose(loss, ref, rtol=5e-3, atol=1e-3), (loss, ref)

    # Default budget-sized-tile path (single tile, no mask).
    X2 = jax.random.normal(k2, (512, 32), dtype=jnp.float32)
    loss2 = jax.block_until_ready(total_coding_rate(X2, eps=0.01))
    ref2 = jax.block_until_ready(_reference_tcr(X2, eps=0.01))
    assert jnp.allclose(loss2, ref2, rtol=5e-3, atol=1e-3), (loss2, ref2)

    print("KERNEL_OK")
</pallas_src>

<mosaic_0001>
module attributes {stable_mosaic.version = 11 : i64} {
  func.func @_tcr_gram_kernel(%arg0: i32, %arg1: i32, %arg2: memref<128x32xf32, #tpu.memory_space<vmem>>, %arg3: memref<1x32x32xf32, #tpu.memory_space<vmem>>) attributes {dimension_semantics = [#tpu.dimension_semantics<parallel>, #tpu.dimension_semantics<arbitrary>], iteration_bounds = array<i64: 2, 3>, scalar_prefetch = 0 : i64, scratch_operands = 0 : i64, tpu.core_type = #tpu.core_type<tc>, window_params = [{transform_indices = @transform_0, window_bounds = array<i64: 128, 32>}, {transform_indices = @transform_1, window_bounds = array<i64: 1, 32, 32>}]} {
    %c0_i32 = arith.constant 0 : i32
    %0 = arith.cmpi eq, %arg1, %c0_i32 : i32
    %1 = arith.extui %0 : i1 to i32
    %c0_i32_0 = arith.constant 0 : i32
    %2 = arith.cmpi ne, %1, %c0_i32_0 : i32
    scf.if %2 {
      %cst_9 = arith.constant 0.000000e+00 : f32
      %20 = vector.broadcast %cst_9 : f32 to vector<32x32xf32>
      %c0_10 = arith.constant 0 : index
      %c0_11 = arith.constant 0 : index
      %c0_12 = arith.constant 0 : index
      %21 = vector.load %arg3[%c0_10, %c0_11, %c0_12] : memref<1x32x32xf32, #tpu.memory_space<vmem>>, vector<1x32x32xf32>
      %22 = vector.shape_cast %21 : vector<1x32x32xf32> to vector<32x32xf32>
      %23 = vector.shape_cast %20 : vector<32x32xf32> to vector<1x32x32xf32>
      tpu.vector_store %arg3[%c0_10, %c0_11, %c0_12], %23 {strides = array<i32>} : memref<1x32x32xf32, #tpu.memory_space<vmem>>, vector<1x32x32xf32>,
    } else {
    }
    %c0 = arith.constant 0 : index
    %c0_1 = arith.constant 0 : index
    %3 = vector.load %arg2[%c0, %c0_1] : memref<128x32xf32, #tpu.memory_space<vmem>>, vector<128x32xf32>
    %c3_i32 = arith.constant 3 : i32
    %4 = arith.muli %arg0, %c3_i32 : i32
    %5 = arith.addi %4, %arg1 : i32
    %c128_i32 = arith.constant 128 : i32
    %6 = arith.muli %5, %c128_i32 : i32
    %c600_i32 = arith.constant 600 : i32
    %7 = arith.subi %c600_i32, %6 : i32
    %8 = tpu.iota {dimensions = array<i32: 0>} : vector<128x32xi32>
    %9 = vector.broadcast %7 : i32 to vector<128x32xi32>
    %10 = arith.cmpi slt, %8, %9 : vector<128x32xi32>
    %cst = arith.constant 0.000000e+00 : f32
    %11 = vector.broadcast %cst : f32 to vector<128x32xf32>
    %12 = arith.select %10, %3, %11 : vector<128x32xi1>, vector<128x32xf32>
    %c0_2 = arith.constant 0 : index
    %c0_3 = arith.constant 0 : index
    %c0_4 = arith.constant 0 : index
    %13 = vector.load %arg3[%c0_2, %c0_3, %c0_4] : memref<1x32x32xf32, #tpu.memory_space<vmem>>, vector<1x32x32xf32>
    %14 = vector.shape_cast %13 : vector<1x32x32xf32> to vector<32x32xf32>
    %cst_5 = arith.constant dense<0.000000e+00> : vector<32x32xf32>
    %15 = tpu.matmul %12, %12, %cst_5 {dimension_numbers = #tpu.dot_dimension_numbers<[0], [0], [1], [1], [0, 1, 1, 1], [], []>} : vector<128x32xf32>, vector<128x32xf32>, vector<32x32xf32> -> vector<32x32xf32>
    %16 = arith.addf %14, %15 : vector<32x32xf32>
    %c0_6 = arith.constant 0 : index
    %c0_7 = arith.constant 0 : index
    %c0_8 = arith.constant 0 : index
    %17 = vector.load %arg3[%c0_6, %c0_7, %c0_8] : memref<1x32x32xf32, #tpu.memory_space<vmem>>, vector<1x32x32xf32>
    %18 = vector.shape_cast %17 : vector<1x32x32xf32> to vector<32x32xf32>
    %19 = vector.shape_cast %16 : vector<32x32xf32> to vector<1x32x32xf32>
    tpu.vector_store %arg3[%c0_6, %c0_7, %c0_8], %19 {strides = array<i32>} : memref<1x32x32xf32, #tpu.memory_space<vmem>>, vector<1x32x32xf32>,
    return
  }
  func.func @transform_0(%arg0: i32, %arg1: i32) -> (i32, i32) {
    %c3_i32 = arith.constant 3 : i32
    %0 = arith.muli %arg0, %c3_i32 : i32
    %1 = arith.addi %0, %arg1 : i32
    %c4_i32 = arith.constant 4 : i32
    %2 = arith.minsi %1, %c4_i32 : i32
    %c0_i32 = arith.constant 0 : i32
    %c0_i32_0 = arith.constant 0 : i32
    return %2, %c0_i32 : i32, i32
  }
  func.func @transform_1(%arg0: i32, %arg1: i32) -> (i32, i32, i32) {
    %c0_i32 = arith.constant 0 : i32
    %c0_i32_0 = arith.constant 0 : i32
    %c0_i32_1 = arith.constant 0 : i32
    return %arg0, %c0_i32, %c0_i32_0 : i32, i32, i32
  }
}

</mosaic_0001>

<bundles_post_ra>
// kernel: tpu_custom_call.1
= control target key start
LH: loop header
LB: loop body
LE: loop exit
PB: predicated region body
PF: predicated region fallthrough
CT: control target
= control target key end

     0   :  { %6 = vsyncpa [#allocation3], 0  ;;  %s1178_s0 = inlined_call_operand.vmem [shape: f32[600,32], index: 0, kind: input, shape index: {}]   ;;  %s1179_s1 = inlined_call_operand.hbm [shape: f32[2,32,32], index: 1, kind: output, shape index: {}]  }
   0x1   :  { %8 = vsyncpa [#allocation3 + $0x1], 0  ;;  %s682_s6 = smov 0   ;;  %s684_s7 = smov 0  }
   0x2   :  { %s686_s8 = smov 0   ;;  %s688_s9 = smov 0  }
   0x3   :  { %s690_s10 = smov 0   ;;  %s692_s11 = smov 0  }
   0x4   :  { %s694_s12 = smov 0   ;;  %s696_s13 = smov 0  }
   0x5 LB: > { %s419_s14 = sadd.s32 4294967295, %s667_s13   ;;  %s420_s15 = sadd.s32 4294967294, %s667_s13   ;;  %s667_s13 = sphi %s696_s13, %s14_s13   ;;  %s663_s12 = sphi %s694_s12, %s1220_s12   ;;  %s659_s11 = sphi %s692_s11, %s1219_s11   ;;  %s655_s10 = sphi %s690_s10, %s1218_s10   ;;  %s651_s9 = sphi %s688_s9, %s1217_s9   ;;  %s647_s8 = sphi %s686_s8, %s1216_s8   ;;  %s643_s7 = sphi %s684_s7, %s1215_s7   ;;  %s639_s6 = sphi %s682_s6, %s1214_s6  }
   0x6   : > { %s23_s16 = sadd.s32 1, %s659_s11  ;;  %s26_s17 = sadd.s32 1, %s663_s12 }
   0x7   : > { %p24_p0 = scmp.ge.s32.totalorder %s23_s16, 3  ;;  %p77_p1 = scmp.ne.s32.totalorder %s647_s8, %s643_s7 }
   0x8   : > { %p78_p2 = scmp.eq.s32.totalorder %s419_s14, 5  ;;  %p83_p4 = scmp.ne.s32.totalorder %s643_s7, %s639_s6 }
   0x9   : > { %s1222_s16 = smov (%p24_p0, %s23_s16), 0  ;;  %s1224_s17 = smov (!%p24_p0, %s26_s17), %s663_s12 }
   0xa   : > { %p731_p3 = por %p78_p2, %p77_p1  ;;  %p28_p5 = scmp.ge.s32.totalorder %s1224_s17, 2 }
   0xb   : > { %p84_p6 = scmp.eq.s32.totalorder %s420_s15, 5  ;;  %p423_p7 = scmp.ge.s32.totalorder %s667_s13, 1 }
   0xc   : > { %p127_p8 = scmp.lt.s32.totalorder %s667_s13, 7  ;;  %s1226_s17 = smov (%p28_p5, %s1224_s17), 0 }
   0xd   : > { %p741_p9 = por %p84_p6, %p83_p4  ;;  %s64_s20 = ssub.s32 %s663_s12, %s1226_s17 }
   0xe   : > { %p128_p10 = pnand %p423_p7, %p127_p8  ;;  %s67_s21 = sadd.s32 1, %s647_s8 }
   0xf   : > { %p65_p11 = scmp.eq.s32.totalorder %s64_s20, 0  ;;  %s152_s23 = sand.u32 (!%p128_p10), 1, %s643_s7  }
  0x10   : > { %131 = sbr.rel (%p128_p10) target bundleno = 369 (0x171), region = 24  ;;  %s424_s25 = sshll.u32 (!%p128_p10), %s152_s23, 5 }
  0x11   : > { %s749_s22 = scalar_select %p65_p11, %s647_s8, %s67_s21  }
  0x12   : > { %s155_s24 = smul.u32 (!%p128_p10), 3, %s655_s10  ;;  %s761_s4 = scalar_lea.vmem (!%p128_p10), [#allocation2], %s424_s25 }
  0x13   : > { %p427_p0 = scmp.ne.s32.totalorder (!%p128_p10), %s651_s9, 0 }
  0x14   : > { %s156_s26 = sadd.s32 (!%p128_p10), %s651_s9, %s155_s24 }
  0x15   : > { %p157_p12 = scmp.lt.s32.totalorder %s156_s26, 4 }
  0x17   : > { %s158_s27 = scalar_select %p157_p12, %s156_s26, 4 }
  0x19   : > { %s425_s28 = sshll.u32 %s158_s27, 4 }
  0x1a   : > { %p164_p13 = scmp.lt.s32.totalorder %s425_s28, 74  ;;  %180 = sbr.rel (%p427_p0) target bundleno = 36 (0x24), region = 28 }
  0x1c   : > { %s1228_s28 = smov (!%p164_p13, %s425_s28), 74 }
  0x1d   : > { %s426_s29 = sshll.u32 %s1228_s28, 3 }
  0x1e   : > { %s759_s3 = scalar_lea.vmem %s1178_s0, %s426_s29 }
  0x1f   : > { %vm181_vm0 = vcmask 261120   ;;  %v669_v0 = vmov 0.0  }
  0x20   : > { %182 = vst.msk [vmem:[%s761_s4] sm:$0xff] %vm181_vm0, %v669_v0 }
  0x21   : > { %183 = vst.msk [vmem:[%s761_s4 + $0x8] sm:$0xff] %vm181_vm0, %v669_v0 }
  0x22   : > { %184 = vst.msk [vmem:[%s761_s4 + $0x10] sm:$0xff] %vm181_vm0, %v669_v0 }
  0x23   : > { %185 = vst.msk [vmem:[%s761_s4 + $0x18] sm:$0xff] %vm181_vm0, %v669_v0 }
  0x24 PF: > { %s428_s5 = sshll.u32 %s156_s26, 7  ;;  %v206_v1 = vlaneseq  ;;  %v769_v2 = vld [vmem:[%s759_s3] sm:$0xff]  ;;  %v786_v8 = vld [vmem:[%s759_s3 + $0x8] sm:$0xff]  ;;  %v798_v12 = vld [vmem:[%s759_s3 + $0x10] sm:$0xff]  ;;  %s450_s9 = sshll.u32 %s655_s10, 5 }
  0x25   : > { %s205_s14 = ssub.s32 600, %s428_s5  ;;  %v810_v16 = vld [vmem:[%s759_s3 + $0x18] sm:$0xff]  ;;  %v822_v20 = vld [vmem:[%s759_s3 + $0x20] sm:$0xff]  ;;  %v834_v24 = vld [vmem:[%s759_s3 + $0x28] sm:$0xff]  ;;  %s342_s21 = scalar_lea.hbm %s1179_s1, %s450_s9 }
  0x26   : > { %v771_v3 = vshrl.u32 %v206_v1, 7  ;;  %v773_v4 = vstv %s205_s14  ;;  %v846_v28 = vld [vmem:[%s759_s3 + $0x30] sm:$0xff]  ;;  %v858_v32 = vld [vmem:[%s759_s3 + $0x38] sm:$0xff]  ;;  %v870_v36 = vld [vmem:[%s759_s3 + $0x40] sm:$0xff]  ;;  %s343_s24 = sshll.u32 %s761_s4, 4  ;;  %s345_s25 = sshll.u32 %s342_s21, 4  ;;  %s344_s24 = int_to_ptr.vmem [resolvable:$true] %s343_s24  ;;  %s346_s25 = int_to_ptr.hbm [resolvable:$true] %s345_s25 }
  0x27   : > { %v195_v40 = vld [vmem:[%s759_s3 + $0x48] sm:$0xff]  ;;  %v196_v44 = vld [vmem:[%s759_s3 + $0x50] sm:$0xff]  ;;  %v197_v50 = vld [vmem:[%s759_s3 + $0x58] sm:$0xff]  ;;  %s331_s10 = scalar_lea.sflag [#allocation3], %s152_s23  ;;  %s587_s26 = sshra.s32 %s346_s25, 4  ;;  %s588_s26 = int_to_ptr.hbm [resolvable:$true] %s587_s26 }
  0x28   : > { %vm777_vm1 = vcmp.lt.s32.totalorder %v771_v3, %v773_v4  ;;  %v208_v6 = vadd.s32 8, %v771_v3  ;;  %v209_v11 = vadd.s32 16, %v771_v3  ;;  %v210_v15 = vadd.s32 24, %v771_v3  ;;  %v909_v53 = vld [vmem:[%s759_s3 + $0x78] sm:$0xff]  ;;  %v924_v56 = vld [vmem:[%s759_s3 + $0x70] sm:$0xff]  ;;  %v199_v59 = vld [vmem:[%s759_s3 + $0x68] sm:$0xff]  ;;  %p594_p5 = scmp.lt.s32.totalorder %s588_s26, %s1179_s1 }
  0x29   : > { %v240_v7 = vsel %vm777_vm1, %v769_v2, 0.0  ;;  %v211_v19 = vadd.s32 32, %v771_v3  ;;  %v212_v23 = vadd.s32 40, %v771_v3  ;;  %v213_v27 = vadd.s32 48, %v771_v3  ;;  %v198_v61 = vld [vmem:[%s759_s3 + $0x60] sm:$0xff]  ;;  %v258_v13 = vld [vmem:[%s761_s4 + $0x10] sm:$0xff] }
  0x2a   : > { %260 = vxpose.xlu0.b32.start [1/16] (narrow) %v240_v7, 32  ;;  %vm789_vm2 = vcmp.lt.s32.totalorder %v208_v6, %v773_v4  ;;  %vm801_vm3 = vcmp.lt.s32.totalorder %v209_v11, %v773_v4  ;;  %vm813_vm4 = vcmp.lt.s32.totalorder %v210_v15, %v773_v4  ;;  %v214_v31 = vadd.s32 56, %v771_v3  ;;  %v256_v9 = vld [vmem:[%s761_s4] sm:$0xff]  ;;  %s589_s27 = scalar_lea.hbm %s588_s26, 32  ;;  %s593_s30 = scalar_lea.hbm %s1179_s1, 64 }
  0x2b   : > { %v241_v10 = vsel %vm789_vm2, %v786_v8, 0.0  ;;  %v242_v14 = vsel %vm801_vm3, %v798_v12, 0.0  ;;  %v243_v18 = vsel %vm813_vm4, %v810_v16, 0.0  ;;  %vm825_vm5 = vcmp.lt.s32.totalorder %v211_v19, %v773_v4  ;;  %p590_p1 = scmp.ne.s32.totalorder %s588_s26, %s589_s27  ;;  %p595_p6 = scmp.lt.s32.totalorder %s593_s30, %s589_s27 }
  0x2c   : > { %v244_v22 = vsel %vm825_vm5, %v822_v20, 0.0  ;;  %vm837_vm6 = vcmp.lt.s32.totalorder %v212_v23, %v773_v4  ;;  %vm849_vm7 = vcmp.lt.s32.totalorder %v213_v27, %v773_v4  ;;  %vm861_vm8 = vcmp.lt.s32.totalorder %v214_v31, %v773_v4 }
  0x2d   : > { %v245_v26 = vsel %vm837_vm6, %v834_v24, 0.0  ;;  %v246_v30 = vsel %vm849_vm7, %v846_v28, 0.0  ;;  %v247_v34 = vsel %vm861_vm8, %v858_v32, 0.0  ;;  %v215_v35 = vadd.s32 64, %v771_v3  ;;  %p591_p2 = pnand %p590_p1, %p731_p3  ;;  %p596_p7 = por %p595_p6, %p594_p5 }
  0x2e   : > { %v216_v39 = vadd.s32 72, %v771_v3  ;;  %v217_v43 = vadd.s32 80, %v771_v3  ;;  %v218_v47 = vadd.s32 88, %v771_v3  ;;  %v221_v48 = vadd.s32 112, %v771_v3 }
  0x2f   : > { %vm873_vm9 = vcmp.lt.s32.totalorder %v215_v35, %v773_v4  ;;  %v222_v49 = vadd.s32 120, %v771_v3  ;;  %v220_v52 = vadd.s32 104, %v771_v3  ;;  %v219_v55 = vadd.s32 96, %v771_v3  ;;  %p592_p4 = pneg %p591_p2 }
  0x30   : > { %v248_v38 = vsel %vm873_vm9, %v870_v36, 0.0  ;;  %vm883_vm10 = vcmp.lt.s32.totalorder %v216_v39, %v773_v4  ;;  %vm892_vm11 = vcmp.lt.s32.totalorder %v217_v43, %v773_v4  ;;  %vm903_vm12 = vcmp.lt.s32.totalorder %v218_v47, %v773_v4 }
  0x31   : > { %v249_v42 = vsel %vm883_vm10, %v195_v40, 0.0  ;;  %v250_v46 = vsel %vm892_vm11, %v196_v44, 0.0  ;;  %vm912_vm13 = vcmp.lt.s32.totalorder %v222_v49, %v773_v4  ;;  %vm927_vm14 = vcmp.lt.s32.totalorder %v221_v48, %v773_v4  ;;  %p597_p8 = pnand %p596_p7, %p592_p4 }
  0x32   : > { %261 = vxpose.xlu0.b32.cont [2/16] (narrow) %v241_v10, 32  ;;  %429 = vmatpush.msk.msra.mxu0 %vm912_vm13, %v909_v53  ;;  %v251_v58 = vsel %vm903_vm12, %v197_v50, 0.0  ;;  %vm947_vm15 = vcmp.lt.s32.totalorder %v220_v52, %v773_v4  ;;  %vm963_vm0 = vcmp.lt.s32.totalorder %v219_v55, %v773_v4  ;;  %v254_v1 = vsel %vm927_vm14, %v924_v56, 0.0 }
  0x33   : > { %451 = vmatpush.msk.msra.mxu1 %vm912_vm13, %v909_v53  ;;  %452 = vmatpush.msk.msra.mxu2 %vm912_vm13, %v909_v53  ;;  %v252_v63 = vsel %vm963_vm0, %v198_v61, 0.0  ;;  %v253_v0 = vsel %vm947_vm15, %v199_v59, 0.0  ;;  %v255_v3 = vsel %vm912_vm13, %v909_v53, 0.0 }
  0x34   : > { %453 = vmatpush.msk.msra.mxu3 %vm912_vm13, %v909_v53  ;;  %430 = vmatpush.msk.msra.mxu0 %vm927_vm14, %v924_v56 }
  0x35   : > { %454 = vmatpush.msk.msra.mxu1 %vm927_vm14, %v924_v56  ;;  %455 = vmatpush.msk.msra.mxu2 %vm927_vm14, %v924_v56 }
  0x36   : > { %456 = vmatpush.msk.msra.mxu3 %vm927_vm14, %v924_v56  ;;  %431 = vmatpush.msk.msra.mxu0 %vm947_vm15, %v199_v59 }
  0x37   : > { %457 = vmatpush.msk.msra.mxu1 %vm947_vm15, %v199_v59  ;;  %458 = vmatpush.msk.msra.mxu2 %vm947_vm15, %v199_v59 }
  0x38   : > { %432 = vmatpush.msk.msra.mxu0 %vm963_vm0, %v198_v61  ;;  %459 = vmatpush.msk.msra.mxu3 %vm947_vm15, %v199_v59 }
  0x39   : > { %460 = vmatpush.msk.msra.mxu1 %vm963_vm0, %v198_v61  ;;  %461 = vmatpush.msk.msra.mxu2 %vm963_vm0, %v198_v61 }
  0x3a   : > { %262 = vxpose.xlu0.b32.cont [3/16] (narrow) %v242_v14, 32  ;;  %433 = vmatpush.msk.msra.mxu0 %vm903_vm12, %v197_v50 }
  0x3b   : > { %463 = vmatpush.msk.msra.mxu1 %vm903_vm12, %v197_v50  ;;  %464 = vmatpush.msk.msra.mxu2 %vm903_vm12, %v197_v50 }
  0x3c   : > { %462 = vmatpush.msk.msra.mxu3 %vm963_vm0, %v198_v61  ;;  %434 = vmatpush.msk.msra.mxu0 %vm892_vm11, %v196_v44 }
  0x3d   : > { %466 = vmatpush.msk.msra.mxu1 %vm892_vm11, %v196_v44  ;;  %467 = vmatpush.msk.msra.mxu2 %vm892_vm11, %v196_v44 }
  0x3e   : > { %465 = vmatpush.msk.msra.mxu3 %vm903_vm12, %v197_v50  ;;  %435 = vmatpush.msk.msra.mxu0 %vm883_vm10, %v195_v40 }
  0x3f   : > { %469 = vmatpush.msk.msra.mxu1 %vm883_vm10, %v195_v40  ;;  %470 = vmatpush.msk.msra.mxu2 %vm883_vm10, %v195_v40 }
  0x40   : > { %436 = vmatpush.msk.msra.mxu0 %vm873_vm9, %v870_v36  ;;  %468 = vmatpush.msk.msra.mxu3 %vm892_vm11, %v196_v44 }
  0x41   : > { %472 = vmatpush.msk.msra.mxu1 %vm873_vm9, %v870_v36  ;;  %473 = vmatpush.msk.msra.mxu2 %vm873_vm9, %v870_v36 }
  0x42   : > { %263 = vxpose.xlu0.b32.cont [4/16] (narrow) %v243_v18, 32  ;;  %437 = vmatpush.msk.msra.mxu0 %vm861_vm8, %v858_v32 }
  0x43   : > { %475 = vmatpush.msk.msra.mxu1 %vm861_vm8, %v858_v32  ;;  %476 = vmatpush.msk.msra.mxu2 %vm861_vm8, %v858_v32 }
  0x44   : > { %471 = vmatpush.msk.msra.mxu3 %vm883_vm10, %v195_v40  ;;  %438 = vmatpush.msk.msra.mxu0 %vm849_vm7, %v846_v28 }
  0x45   : > { %478 = vmatpush.msk.msra.mxu1 %vm849_vm7, %v846_v28  ;;  %479 = vmatpush.msk.msra.mxu2 %vm849_vm7, %v846_v28 }
  0x46   : > { %474 = vmatpush.msk.msra.mxu3 %vm873_vm9, %v870_v36  ;;  %439 = vmatpush.msk.msra.mxu0 %vm837_vm6, %v834_v24 }
  0x47   : > { %481 = vmatpush.msk.msra.mxu1 %vm837_vm6, %v834_v24  ;;  %482 = vmatpush.msk.msra.mxu2 %vm837_vm6, %v834_v24 }
  0x48   : > { %440 = vmatpush.msk.msra.mxu0 %vm825_vm5, %v822_v20  ;;  %477 = vmatpush.msk.msra.mxu3 %vm861_vm8, %v858_v32 }
  0x49   : > { %484 = vmatpush.msk.msra.mxu1 %vm825_vm5, %v822_v20  ;;  %485 = vmatpush.msk.msra.mxu2 %vm825_vm5, %v822_v20 }
  0x4a   : > { %264 = vxpose.xlu0.b32.cont [5/16] (narrow) %v244_v22, 32  ;;  %441 = vmatpush.msk.msra.mxu0 %vm813_vm4, %v810_v16 }
  0x4b   : > { %487 = vmatpush.msk.msra.mxu1 %vm813_vm4, %v810_v16  ;;  %488 = vmatpush.msk.msra.mxu2 %vm813_vm4, %v810_v16 }
  0x4c   : > { %480 = vmatpush.msk.msra.mxu3 %vm849_vm7, %v846_v28  ;;  %442 = vmatpush.msk.msra.mxu0 %vm801_vm3, %v798_v12 }
  0x4d   : > { %490 = vmatpush.msk.msra.mxu1 %vm801_vm3, %v798_v12  ;;  %491 = vmatpush.msk.msra.mxu2 %vm801_vm3, %v798_v12 }
  0x4e   : > { %483 = vmatpush.msk.msra.mxu3 %vm837_vm6, %v834_v24  ;;  %443 = vmatpush.msk.msra.mxu0 %vm789_vm2, %v786_v8 }
  0x4f   : > { %493 = vmatpush.msk.msra.mxu1 %vm789_vm2, %v786_v8  ;;  %494 = vmatpush.msk.msra.mxu2 %vm789_vm2, %v786_v8 }
  0x50   : > { %444 = vmatpush.msk.msra.mxu0 %vm777_vm1, %v769_v2  ;;  %486 = vmatpush.msk.msra.mxu3 %vm825_vm5, %v822_v20 }
  0x51   : > { %496 = vmatpush.msk.msra.mxu1 %vm777_vm1, %v769_v2  ;;  %497 = vmatpush.msk.msra.mxu2 %vm777_vm1, %v769_v2 }
  0x52   : > { %265 = vxpose.xlu0.b32.cont [6/16] (narrow) %v245_v26, 32  ;;  %489 = vmatpush.msk.msra.mxu3 %vm813_vm4, %v810_v16  ;;  %v259_v16 = vld [vmem:[%s761_s4 + $0x18] sm:$0xff] }
  0x54   : > { %492 = vmatpush.msk.msra.mxu3 %vm801_vm3, %v798_v12 }
  0x56   : > { %495 = vmatpush.msk.msra.mxu3 %vm789_vm2, %v786_v8  ;;  %vm325_vm2 = vcmask 261120  }
  0x58   : > { %498 = vmatpush.msk.msra.mxu3 %vm777_vm1, %v769_v2  ;;  %v257_v2 = vld [vmem:[%s761_s4 + $0x8] sm:$0xff] }
  0x5a   : > { %266 = vxpose.xlu0.b32.cont [7/16] (narrow) %v246_v30, 32 }
  0x62   : > { %267 = vxpose.xlu0.b32.cont [8/16] (narrow) %v247_v34, 32 }
  0x6a   : > { %268 = vxpose.xlu0.b32.cont [9/16] (narrow) %v248_v38, 32 }
  0x72   : > { %269 = vxpose.xlu0.b32.cont [10/16] (narrow) %v249_v42, 32 }
  0x7a   : > { %270 = vxpose.xlu0.b32.cont [11/16] (narrow) %v250_v46, 32 }
  0x82   : > { %271 = vxpose.xlu0.b32.cont [12/16] (narrow) %v251_v58, 32 }
  0x8a   : > { %272 = vxpose.xlu0.b32.cont [13/16] (narrow) %v252_v63, 32 }
  0x92   : > { %273 = vxpose.xlu0.b32.cont [14/16] (narrow) %v253_v0, 32 }
  0x9a   : > { %274 = vxpose.xlu0.b32.cont [15/16] (narrow) %v254_v1, 32 }
  0xa2   : > { %275 = vxpose.xlu0.b32.end [16/16] (narrow) %v255_v3, 32 }
  0xce   : > { %v276_v4 = vpop.trf.xlu0 }
  0xcf   : > { %308 = vmatmul.f32.vlgmr.msra.gmra.mxu0 %v276_v4 }
  0xd6   : > { %v277_v6 = vpop.trf.xlu0 }
  0xd7   : > { %311 = vmatmul.f32.vlgmr.msra.gmra.mxu1 %v277_v6 }
  0xde   : > { %v278_v7 = vpop.trf.xlu0 }
  0xdf   : > { %314 = vmatmul.f32.vlgmr.msra.gmra.mxu2 %v278_v7 }
  0xe6   : > { %v279_v10 = vpop.trf.xlu0 }
  0xe7   : > { %317 = vmatmul.f32.vlgmr.msra.gmra.mxu3 %v279_v10 }
 0x14c   : > { %v309_v11 = vpop.f32.mrf.mxu0 }
 0x14d   : > { %v321_v8 = vadd.f32 %v309_v11, %v256_v9 }
 0x14f   : > { %326 = vst.msk [vmem:[%s761_s4] sm:$0xff] %vm325_vm2, %v321_v8 }
 0x154   : > { %v312_v5 = vpop.f32.mrf.mxu1 }
 0x155   : > { %v322_v12 = vadd.f32 %v312_v5, %v257_v2 }
 0x157   : > { %327 = vst.msk [vmem:[%s761_s4 + $0x8] sm:$0xff] %vm325_vm2, %v322_v12 }
 0x162   : > { %v315_v14 = vpop.f32.mrf.mxu2 }
 0x163   : > { %v323_v15 = vadd.f32 %v315_v14, %v258_v13 }
 0x165   : > { %328 = vst.msk [vmem:[%s761_s4 + $0x10] sm:$0xff] %vm325_vm2, %v323_v15 }
 0x16a   : > { %v318_v17 = vpop.f32.mrf.mxu3 }
 0x16b   : > { %v324_v18 = vadd.f32 %v318_v17, %v259_v16 }
 0x16d   : > { %329 = vst.msk [vmem:[%s761_s4 + $0x18] sm:$0xff] %vm325_vm2, %v324_v18 }
 0x16e   : > { %600 = shalt.err (!%p597_p8)
}
 0x16f   : > { %s670_s23 = smov 128   ;;  %s671_s4 = smov 8  }
 0x170   : > { %499 = dma.vmem_to_hbm [thread:$0]  (%p731_p3), %s344_s24, 512, %s346_s25, %s331_s10, %s670_s23, %s670_s23, %s671_s4  }
 0x171 PF: > { %p505_p10 = scmp.ge.s32.totalorder %s667_s13, 2  ;;  %s360_s5 = sand.u32 1, %s639_s6  }
 0x172   : > { %s361_s14 = scalar_lea.sflag [#allocation3], %s360_s5 }
 0x173   : > { %p502_p11 = pnand %p505_p10, %p741_p9 }
 0x175   : > { %p503_p12 = pneg %p502_p11 }
 0x177   : > { %634 = dma.done.wait (%p503_p12), %s361_s14, 512  }
 0x178   : > { %636 = vsyncadd (%p503_p12), %s361_s14, 4294966784  ;;  %s14_s13 = sadd.s32 1, %s667_s13   ;;  %s1214_s6 = smov %s643_s7 }
 0x179   : > { %p11_p13 = scmp.ge.s32.totalorder %s14_s13, 8   ;;  %s1215_s7 = smov %s647_s8 }
 0x17a   : > { %s1216_s8 = smov %s749_s22  ;;  %s1217_s9 = smov %s659_s11 }
 0x17b   : > { %s1218_s10 = smov %s663_s12  ;;  %s1219_s11 = smov %s1222_s16 }
 0x17c   : > { %s1220_s12 = smov %s1226_s17  ;;  %13 = sbr.rel (!%p11_p13) target bundleno = 5 (0x5), region = 63 }
 0x181   :  { %367 = vsyncpa [#allocation3], 1 }
 0x182   :  { %369 = vsyncpa [#allocation3 + $0x1], 1 }

</bundles_post_ra>
